<compile_context>
chip_gen: v5e
topology: v5e:2x2
jax: 0.10.0
libtpu: 0.0.40
codegen_flags: <defaults>
</compile_context>

<pallas_src>
import functools

import jax
import jax.numpy as jnp
from jax.experimental import pallas as pl
from jax.experimental.pallas import tpu as pltpu


def _round_up(a: int, m: int) -> int:
    return (a + m - 1) // m * m


def _vmem_capacity_bytes() -> int:
    """Per-TensorCore VMEM capacity; conservative (v7x) fallback."""
    try:
        cap = int(pltpu.get_tpu_info().vmem_capacity_bytes)
        if cap > 0:
            return cap
    except Exception:
        pass
    return 64 << 20


def _graph_sum_kernel(x_ref, o_ref, acc_ref, *, n_nodes, t_nodes, nk_inner,
                      inv_count, mask_tail):
    """Per-graph mean over node features.

    x_ref:   (BB, tN, F) VMEM tile — BB graphs, tN nodes, F features.
    o_ref:   (1, 1, BB)  lane-dense output block (resident across the
                         innermost reduction axis).
    acc_ref: (BB, F)     f32 VMEM scratch — lane-shaped partial sums so the
                         steady-state loop stays load+add; the cross-lane
                         reduce/relayout happens only in the finalize.
    """
    k = pl.program_id(2)

    @pl.when(k == 0)
    def _():
        acc_ref[...] = jnp.zeros_like(acc_ref)

    x = x_ref[...].astype(jnp.float32)                       # (BB, tN, F)
    if mask_tail:
        # Mask the out-of-range node rows of the (global) tail block instead
        # of padding the input in HBM.
        node0 = (pl.program_id(1) * nk_inner + k) * t_nodes
        nidx = node0 + jax.lax.broadcasted_iota(jnp.int32, x.shape, 1)
        x = jnp.where(nidx < n_nodes, x, 0.0)

    acc_ref[...] += jnp.sum(x, axis=1)                        # (BB, F)

    @pl.when(k == pl.num_programs(2) - 1)
    def _():
        means = jnp.sum(acc_ref[...], axis=1) * inv_count     # (BB,) — once
        o_ref[...] = means.reshape(o_ref.shape).astype(o_ref.dtype)


def graph_mean_metric(x: jax.Array, *, tile_budget_bytes: int | None = None) -> jax.Array:
    """Per-graph mean of node features with a Pallas TPU kernel.

    x: (B, N, F) tensor.  Returns (B,) float32 means.
    """
    B, N, F = x.shape
    itemsize = jnp.dtype(x.dtype).itemsize
    sub = {4: 8, 2: 16, 1: 32}.get(itemsize, 8)         # sublane multiple
    cast_bytes = 0 if x.dtype == jnp.float32 else 4     # f32 cast temporary

    # ---- generation-aware VMEM budget -----------------------------------
    vmem_cap = _vmem_capacity_bytes()                    # 128 MiB v5e/v6e, 64 MiB v7x
    vmem_limit = max(32 << 20, min(vmem_cap // 2, 64 << 20))
    bufs = 2 + (cast_bytes // itemsize)                  # dbl-buffer + cast temp
    tile_budget = (tile_budget_bytes if tile_budget_bytes is not None
                   else (vmem_limit * 7 // 10) // bufs)

    per_graph_bytes = N * F * itemsize
    row_bytes = F * itemsize

    # ---- graphs per block (BB) -------------------------------------------
    # Single full-extent batch block when small (lane-legal (1,1,B) output);
    # otherwise 128-multiples so every output block stays lane-dense.
    if B <= 128 or B * per_graph_bytes <= tile_budget:
        BB = B
    else:
        BB = max(128, (tile_budget // max(per_graph_bytes, 1)) // 128 * 128)
        BB = min(BB, _round_up(B, 128))
        if BB >= B:
            BB = B
    nb = pl.cdiv(B, BB)

    # ---- node tile (tN): multiple of the sublane count or full extent ----
    nodes_budget = max(sub, (tile_budget // max(BB * row_bytes, 1)) // sub * sub)
    if nodes_budget >= N:
        if N > sub:
            # Split the node axis anyway (2-4 blocks) so input DMA
            # double-buffers instead of grid=(1,1,1) serializing.
            nk_target = 4 if N >= 4 * sub else 2
            tN = min(_round_up(pl.cdiv(N, nk_target), sub), _round_up(N, sub))
        else:
            tN = N                                       # full-extent tiny axis
    else:
        tN = nodes_budget
    nk = pl.cdiv(N, tN)

    # ---- split the reduction across two 'parallel' blocks (v7x 2 TCs) ----
    if nb == 1 and nk >= 2 and nk % 2 == 0:
        nsplit, nk_inner = 2, nk // 2
    else:
        nsplit, nk_inner = 1, nk

    mask_tail = (N % tN) != 0
    inv_count = float(1.0 / (N * F))
    out_w = nb * BB

    # Bump the VMEM limit if the chosen tiles need it (stay below physical).
    tile_bytes = BB * tN * F * itemsize
    acc_bytes = BB * F * 4
    vmem_needed = tile_bytes * bufs + acc_bytes + (2 << 20)
    vmem_limit = min(max(vmem_limit, vmem_needed), max(32 << 20, vmem_cap * 9 // 10))

    cost = pl.CostEstimate(
        flops=B * N * F,                                  # one add per element
        transcendentals=0,
        bytes_accessed=B * N * F * itemsize + nsplit * out_w * 4,
    )

    kernel = functools.partial(
        _graph_sum_kernel,
        n_nodes=N, t_nodes=tN, nk_inner=nk_inner,
        inv_count=inv_count, mask_tail=mask_tail)

    out = pl.pallas_call(
        kernel,
        out_shape=jax.ShapeDtypeStruct((nsplit, 1, out_w), jnp.float32),
        grid_spec=pltpu.PrefetchScalarGridSpec(
            num_scalar_prefetch=0,
            grid=(nb, nsplit, nk_inner),
            in_specs=[pl.BlockSpec((BB, tN, F),
                                   lambda b, s, k: (b, s * nk_inner + k, 0))],
            out_specs=pl.BlockSpec((1, 1, BB), lambda b, s, k: (s, 0, b)),
            scratch_shapes=[pltpu.VMEM((BB, F), jnp.float32)],
        ),
        compiler_params=pltpu.CompilerParams(
            dimension_semantics=("parallel", "parallel", "arbitrary"),
            vmem_limit_bytes=int(vmem_limit),
        ),
        cost_estimate=cost,
    )(x)

    # Add the two reduction partials (if split) and drop any garbage columns.
    res = out[0, 0] if nsplit == 1 else out.sum(axis=(0, 1))
    return res[:B]


class FragSamplingMetrics:
    """JAX port of dgd.analysis.frag_utils.FragSamplingMetrics.

    Module for computing statistics between the generated graphs and test
    graphs.  The reference forward() is a no-op unless 'example_metric' is
    requested, in which case it prints a status line.
    """

    def __init__(self, dataloaders=None, metrics_list=[]):
        self.metrics_list = metrics_list

    def forward(self, generated_graphs, name, current_epoch, val_counter,
                save_graphs=True, test=False):
        """Compare generated_graphs list with test graphs."""
        if 'example_metric' in self.metrics_list:
            print('Computing example_metric stats..')
            # Pallas-backed statistic over the generated graphs' dense
            # node-feature tensor (the compute hot path of this module).
            means = graph_mean_metric(generated_graphs)
            jax.block_until_ready(means)
        # Reference module returns None.
        return None

    def __call__(self, *args, **kwargs):
        return self.forward(*args, **kwargs)

    def reset(self):
        pass


if __name__ == "__main__":
    key = jax.random.PRNGKey(0)
    # Small shapes consistent with a batch of generated graphs:
    # batch=2 graphs, 8 nodes each, 128 node features (lane-dense).
    B, N, F = 2, 8, 128
    x = jax.random.normal(key, (B, N, F), dtype=jnp.float32)

    metrics = FragSamplingMetrics(dataloaders=None,
                                  metrics_list=['example_metric'])

    # 1) Fast path: whole batch in one block, single grid step.
    means = graph_mean_metric(x)
    jax.block_until_ready(means)
    ref = jnp.mean(x, axis=(1, 2)).astype(jnp.float32)
    assert means.shape == (B,)
    assert jnp.allclose(means, ref, atol=1e-5, rtol=1e-5), (means, ref)

    # 2) Multi node-block accumulation path (forced small tile budget).
    x2 = jax.random.normal(jax.random.PRNGKey(1), (6, 24, 256), dtype=jnp.float32)
    m2 = graph_mean_metric(x2, tile_budget_bytes=16 << 10)
    jax.block_until_ready(m2)
    r2 = jnp.mean(x2, axis=(1, 2)).astype(jnp.float32)
    assert jnp.allclose(m2, r2, atol=1e-5, rtol=1e-5), (m2, r2)

    # 3) Two-way parallel reduction split + tail-node masking (N % tN != 0),
    #    no jnp.pad anywhere.
    x3 = jax.random.normal(jax.random.PRNGKey(2), (4, 50, 128), dtype=jnp.float32)
    m3 = graph_mean_metric(x3, tile_budget_bytes=32 << 10)
    jax.block_until_ready(m3)
    r3 = jnp.mean(x3, axis=(1, 2)).astype(jnp.float32)
    assert jnp.allclose(m3, r3, atol=1e-5, rtol=1e-5), (m3, r3)

    # Exercise the module forward (reproduces reference print + no-op return).
    out = metrics(x, name="debug", current_epoch=0, val_counter=0,
                  save_graphs=False, test=False)
    assert out is None
    metrics.reset()

    print("KERNEL_OK")
</pallas_src>

<mosaic_0001>
module attributes {stable_mosaic.version = 11 : i64} {
  func.func @_graph_sum_kernel(%arg0: i32, %arg1: i32, %arg2: i32, %arg3: memref<2x8x128xf32, #tpu.memory_space<vmem>>, %arg4: memref<1x1x2xf32, #tpu.memory_space<vmem>>, %arg5: memref<2x128xf32, #tpu.memory_space<vmem>>) attributes {dimension_semantics = [#tpu.dimension_semantics<parallel>, #tpu.dimension_semantics<parallel>, #tpu.dimension_semantics<arbitrary>], iteration_bounds = array<i64: 1, 1, 1>, scalar_prefetch = 0 : i64, scratch_operands = 1 : i64, tpu.core_type = #tpu.core_type<tc>, window_params = [{transform_indices = @transform_0, window_bounds = array<i64: 2, 8, 128>}, {transform_indices = @transform_1, window_bounds = array<i64: 1, 1, 2>}]} {
    %c0_i32 = arith.constant 0 : i32
    %0 = arith.cmpi eq, %arg2, %c0_i32 : i32
    %1 = arith.extui %0 : i1 to i32
    %c0_i32_0 = arith.constant 0 : i32
    %2 = arith.cmpi ne, %1, %c0_i32_0 : i32
    scf.if %2 {
      %cst_9 = arith.constant 0.000000e+00 : f32
      %11 = vector.broadcast %cst_9 : f32 to vector<2x128xf32>
      %c0_10 = arith.constant 0 : index
      %c0_11 = arith.constant 0 : index
      %12 = vector.load %arg5[%c0_10, %c0_11] : memref<2x128xf32, #tpu.memory_space<vmem>>, vector<2x128xf32>
      tpu.vector_store %arg5[%c0_10, %c0_11], %11 {strides = array<i32>} : memref<2x128xf32, #tpu.memory_space<vmem>>, vector<2x128xf32>,
    } else {
    }
    %c0 = arith.constant 0 : index
    %c0_1 = arith.constant 0 : index
    %c0_2 = arith.constant 0 : index
    %3 = vector.load %arg3[%c0, %c0_1, %c0_2] : memref<2x8x128xf32, #tpu.memory_space<vmem>>, vector<2x8x128xf32>
    %c0_3 = arith.constant 0 : index
    %c0_4 = arith.constant 0 : index
    %4 = vector.load %arg5[%c0_3, %c0_4] : memref<2x128xf32, #tpu.memory_space<vmem>>, vector<2x128xf32>
    %cst = arith.constant dense<0.000000e+00> : vector<2x128xf32>
    %5 = vector.multi_reduction <add>, %3, %cst [1] : vector<2x8x128xf32> to vector<2x128xf32>
    %6 = arith.addf %4, %5 : vector<2x128xf32>
    %c0_5 = arith.constant 0 : index
    %c0_6 = arith.constant 0 : index
    %7 = vector.load %arg5[%c0_5, %c0_6] : memref<2x128xf32, #tpu.memory_space<vmem>>, vector<2x128xf32>
    tpu.vector_store %arg5[%c0_5, %c0_6], %6 {strides = array<i32>} : memref<2x128xf32, #tpu.memory_space<vmem>>, vector<2x128xf32>,
    %c0_i32_7 = arith.constant 0 : i32
    %8 = arith.cmpi eq, %arg2, %c0_i32_7 : i32
    %9 = arith.extui %8 : i1 to i32
    %c0_i32_8 = arith.constant 0 : i32
    %10 = arith.cmpi ne, %9, %c0_i32_8 : i32
    scf.if %10 {
      %c0_9 = arith.constant 0 : index
      %c0_10 = arith.constant 0 : index
      %11 = vector.load %arg5[%c0_9, %c0_10] : memref<2x128xf32, #tpu.memory_space<vmem>>, vector<2x128xf32>
      %cst_11 = arith.constant dense<0.000000e+00> : vector<2xf32>
      %12 = vector.multi_reduction <add>, %11, %cst_11 [1] : vector<2x128xf32> to vector<2xf32>
      %cst_12 = arith.constant 9.765625E-4 : f32
      %13 = vector.broadcast %cst_12 : f32 to vector<2xf32>
      %14 = arith.mulf %12, %13 : vector<2xf32>
      %15 = vector.shape_cast %14 : vector<2xf32> to vector<1x1x2xf32>
      %c0_13 = arith.constant 0 : index
      %c0_14 = arith.constant 0 : index
      %c0_15 = arith.constant 0 : index
      %16 = vector.load %arg4[%c0_13, %c0_14, %c0_15] : memref<1x1x2xf32, #tpu.memory_space<vmem>>, vector<1x1x2xf32>
      tpu.vector_store %arg4[%c0_13, %c0_14, %c0_15], %15 {strides = array<i32>} : memref<1x1x2xf32, #tpu.memory_space<vmem>>, vector<1x1x2xf32>,
    } else {
    }
    return
  }
  func.func @transform_0(%arg0: i32, %arg1: i32, %arg2: i32) -> (i32, i32, i32) {
    %c1_i32 = arith.constant 1 : i32
    %0 = arith.muli %arg1, %c1_i32 : i32
    %1 = arith.addi %0, %arg2 : i32
    %c0_i32 = arith.constant 0 : i32
    %c0_i32_0 = arith.constant 0 : i32
    return %arg0, %1, %c0_i32 : i32, i32, i32
  }
  func.func @transform_1(%arg0: i32, %arg1: i32, %arg2: i32) -> (i32, i32, i32) {
    %c0_i32 = arith.constant 0 : i32
    %c0_i32_0 = arith.constant 0 : i32
    return %arg1, %c0_i32, %arg0 : i32, i32, i32
  }
}

</mosaic_0001>

<bundles_post_ra>
// kernel: tpu_custom_call.1
= control target key start
LH: loop header
LB: loop body
LE: loop exit
PB: predicated region body
PF: predicated region fallthrough
CT: control target
= control target key end

     0   :  { %6 = vsyncpa [#allocation4], 0  ;;  %s167_s0 = inlined_call_operand.hbm [shape: f32[2,8,128], index: 0, kind: input, shape index: {}]   ;;  %s168_s1 = inlined_call_operand.hbm [shape: f32[1,1,2], index: 1, kind: output, shape index: {}]  }
   0x1   :  { %7 = vsyncpa [#allocation5], 0  ;;  %s15_s8 = sshll.u32 %s167_s0, 4  ;;  %s146_s9 = smov [#allocation3]   ;;  %s16_s8 = int_to_ptr.hbm [resolvable:$true] %s15_s8 }
   0x2   :  { %s17_s10 = sshll.u32 %s146_s9, 4  ;;  %s147_s11 = smov 128   ;;  %s18_s10 = int_to_ptr.vmem [resolvable:$true] %s17_s10 }
   0x3   :  { %s148_s12 = smov 8  }
   0x4   :  { %23 = dma.hbm_to_vmem [thread:$0]  %s16_s8, 256, %s18_s10, [#allocation4], %s147_s11, %s147_s11, %s148_s12  }
   0x5   :  { %142 = dma.done.wait [#allocation4], 256  }
   0x6   :  { %143 = vsyncadd [#allocation4], 4294967040  ;;  %v149_v0 = vmov 0.0   ;;  %v34_v1 = vld [vmem:[#allocation3] sm:$0xff]  ;;  %v35_v2 = vld [vmem:[#allocation3 + $0x8] sm:$0xff]  ;;  %vm51_vm0 = vcmask 1041409   ;;  %v66_v20 = vlaneseq }
   0x7   :  { %33 = vst [vmem:[#allocation2] sm:$0x3] %v149_v0  ;;  %v37_v3 = vrot.slane %v34_v1, 4  ;;  %v43_v4 = vrot.slane %v35_v2, 4  ;;  %vm60_vm1 = vcmask 1041408   ;;  %s150_s0 = smov [#allocation6]  }
   0x8   :  { %v67_v21 = vand.u32 127, %v66_v20  ;;  %s77_s13 = sshll.u32 %s150_s0, 4  ;;  %s79_s16 = sshll.u32 %s168_s1, 4  ;;  %vm70_vm2 = vcmask 8192   ;;  %s78_s13 = int_to_ptr.vmem [resolvable:$true] %s77_s13  ;;  %s80_s16 = int_to_ptr.hbm [resolvable:$true] %s79_s16 }
   0x9   :  { %v38_v5 = vadd.f32 %v37_v3, %v34_v1  ;;  %v44_v6 = vadd.f32 %v43_v4, %v35_v2 }
   0xb   :  { %v39_v7 = vrot.slane %v38_v5, 2  ;;  %v45_v8 = vrot.slane %v44_v6, 2 }
   0xd   :  { %v40_v9 = vadd.f32 %v39_v7, %v38_v5  ;;  %v46_v10 = vadd.f32 %v45_v8, %v44_v6 }
   0xe   :  { %v36_v13 = vld [vmem:[#allocation2] sm:$0x3] }
   0xf   :  { %v41_v11 = vrot.slane %v40_v9, 1  ;;  %v47_v12 = vrot.slane %v46_v10, 1 }
  0x11   :  { %v42_v14 = vadd.f32 %v41_v11, %v40_v9  ;;  %v48_v15 = vadd.f32 %v47_v12, %v46_v10 }
  0x13   :  { %v52_v16 = vsel %vm51_vm0, %v48_v15, %v42_v14 }
  0x14   :  { %v54_v17 = vadd.f32 %v52_v16, %v36_v13 }
  0x16   :  { %55 = vst [vmem:[#allocation2] sm:$0x3] %v54_v17 }
  0x1d   :  { %v59_v18 = vld [vmem:[#allocation2] sm:$0x3] }
  0x1e   :  { %v61_v19 = vsel %vm60_vm1, %v59_v18, 0.0 }
  0x1f   :  { %62 = vadd.xlane.f32.xlu0 %v61_v19 }
  0x92   :  { %v63_v22 = vpop.xlane.xlu0 %62 }
  0x93   :  { %v64_v23 = vmul.f32 0.0009765625, %v63_v22 }
  0x95   :  { %v68_v24 = vperm.slane %v64_v23, %v67_v21 }
  0x97   :  { %71 = vst.msk [vmem:[#allocation6] sm:$0x1] %vm70_vm2, %v68_v24 }
  0x98   :  { %82 = dma.vmem_to_hbm [thread:$0]  %s78_s13, 16, %s80_s16, [#allocation5]  }
  0x99   :  { %144 = dma.done.wait [#allocation5], 16  }
  0x9a   :  { %145 = vsyncadd [#allocation5], 4294967280 }
  0x9b   :  { %87 = vsyncpa [#allocation4], 1 }
  0x9c   :  { %88 = vsyncpa [#allocation5], 1 }

</bundles_post_ra>
